<compile_context>
chip_gen: v6e
topology: v6e:2x2x1
jax: 0.10.0
libtpu: 0.0.40
codegen_flags: <defaults>
</compile_context>

<pallas_src>
import functools

import jax
import jax.numpy as jnp
from jax.experimental import pallas as pl
from jax.experimental.pallas import tpu as pltpu


_SUB = 16  # sublane granularity for batch tiles (bf16 packs 2 rows / sublane)


def _round_up(n: int, m: int) -> int:
    return ((n + m - 1) // m) * m


def resblock_kernel(x_ref, w13_ref, b1_ref, w2_ref, b23_ref, gamma_ref,
                    beta_ref, o_ref, *, hid_p, out_dim, eps, mxu_dtype):
    # Cast to the MXU operand dtype inside the kernel (no-op if already cast).
    x = x_ref[...].astype(mxu_dtype)

    # Fused fc1 + fc3: one LHS pass of x through the MXU with a wide RHS.
    r = jnp.dot(x, w13_ref[...], preferred_element_type=jnp.float32)
    h = jnp.maximum(r[:, :hid_p] + b1_ref[...], 0.0)        # relu(x@W1 + b1)
    skip = r[:, hid_p:]                                      # x@W3

    # fc2; b2 + b3 are pre-folded into a single bias row.
    y = jnp.dot(h.astype(mxu_dtype), w2_ref[...],
                preferred_element_type=jnp.float32)
    z = y + skip + b23_ref[...]

    # dropout == identity at inference.

    # LayerNorm over the true last dim (eps = 1e-5).  Both the mean and the
    # variance are masked to out_dim so padded lanes never contribute.
    out_p = z.shape[-1]
    inv_d = 1.0 / out_dim
    if out_p != out_dim:                      # trace-time branch (static shapes)
        lane = jax.lax.broadcasted_iota(jnp.int32, (1, out_p), 1)
        lmask = lane < out_dim
        zm = jnp.where(lmask, z, 0.0)
    else:
        lmask = None
        zm = z
    mean = jnp.sum(zm, axis=-1, keepdims=True) * inv_d
    centered = z - mean
    cmask = jnp.where(lmask, centered, 0.0) if lmask is not None else centered
    var = jnp.sum(cmask * cmask, axis=-1, keepdims=True) * inv_d
    zn = centered * jax.lax.rsqrt(var + eps)
    o_ref[...] = (zn * gamma_ref[...] + beta_ref[...]).astype(o_ref.dtype)


@functools.partial(jax.jit,
                   static_argnames=("block_b", "mxu_dtype", "eps", "out_dtype"))
def resblock_forward(x, w1, b1, w2, b2, w3, b3, gamma, beta, *,
                     block_b=512, mxu_dtype=jnp.bfloat16, eps=1e-5,
                     out_dtype=None):
    """x: (B, input_dim).  Weights are (in, out) — already transposed relative
    to PyTorch's nn.Linear (out, in) convention.  LayerNorm/bias math stays
    f32; matmul operands are cast to `mxu_dtype` with f32 accumulation (set
    mxu_dtype=jnp.float32 for bit-tight accuracy)."""
    B, input_dim = x.shape
    hidden_dim = w1.shape[1]
    output_dim = w2.shape[1]
    out_dtype = x.dtype if out_dtype is None else jnp.dtype(out_dtype)
    f32 = jnp.float32

    # Lane-dense feature dims (multiples of 128).
    in_p = _round_up(input_dim, 128)
    hid_p = _round_up(hidden_dim, 128)
    out_p = _round_up(output_dim, 128)
    wide_p = hid_p + out_p

    # ---- Batch tiling -------------------------------------------------------
    # Pad B only to sublane granularity, derive the tile from the tile count so
    # total padding stays <= O(16 * n_tiles) instead of up to (bb - 1).
    block_b = max(_SUB, _round_up(int(block_b), _SUB))
    B16 = _round_up(B, _SUB)
    eff_block = block_b
    if B >= 256:
        # Guarantee >= 2 grid steps so v7x's two TensorCores both get a tile
        # (and the pipeline has something to overlap).  No effect on v5e/v6e.
        eff_block = min(eff_block, max(_SUB, _round_up(B16 // 2, _SUB)))
    n_tiles = pl.cdiv(B16, eff_block)
    bb = _round_up(pl.cdiv(B16, n_tiles), _SUB)
    Bp = bb * n_tiles
    grid = (n_tiles,)

    # ---- Host-side operand prep --------------------------------------------
    # Fuse W1 / W3 into one wide RHS; fold b2 + b3 into one bias row.
    w1p = jnp.pad(w1.astype(f32),
                  ((0, in_p - input_dim), (0, hid_p - hidden_dim)))
    w3p = jnp.pad(w3.astype(f32),
                  ((0, in_p - input_dim), (0, out_p - output_dim)))
    w13p = jnp.concatenate([w1p, w3p], axis=1).astype(mxu_dtype)
    w2p = jnp.pad(w2.astype(f32),
                  ((0, hid_p - hidden_dim), (0, out_p - output_dim))).astype(mxu_dtype)
    b1r = jnp.pad(b1.astype(f32), (0, hid_p - hidden_dim)).reshape(1, hid_p)
    b23r = jnp.pad((b2 + b3).astype(f32), (0, out_p - output_dim)).reshape(1, out_p)
    gr = jnp.pad(gamma.astype(f32), (0, out_p - output_dim)).reshape(1, out_p)
    br = jnp.pad(beta.astype(f32), (0, out_p - output_dim)).reshape(1, out_p)

    # x: avoid the wrapper pad/cast HBM round-trip when already aligned; the
    # MXU-dtype cast happens inside the kernel.  When padding is required,
    # cast first so the extra HBM pass is at the narrow dtype.
    if Bp == B and in_p == input_dim:
        xp = x
    else:
        xp = jnp.pad(x.astype(mxu_dtype),
                     ((0, Bp - B), (0, in_p - input_dim)))

    # ---- VMEM budget (single-buffered weights, double-buffered stream) ------
    mxu_bytes = jnp.dtype(mxu_dtype).itemsize
    x_bytes = jnp.dtype(xp.dtype).itemsize
    out_bytes = jnp.dtype(out_dtype).itemsize
    need = ((in_p * wide_p + hid_p * out_p) * mxu_bytes     # resident weights (x1)
            + 4 * wide_p * 4                                # bias rows / gamma / beta
            + 2 * bb * in_p * x_bytes                       # x tiles (double-buffered)
            + 2 * bb * out_p * out_bytes                    # out tiles (double-buffered)
            + bb * (wide_p + hid_p + 2 * out_p) * 4         # f32 intermediates
            + (1 << 20))
    vmem_cap = 64 << 20                                     # conservative fallback
    try:
        vmem_cap = int(pltpu.get_tpu_info().vmem_capacity_bytes)
    except Exception:
        pass
    vmem_limit = int(min(max(int(1.5 * need), 32 << 20), int(0.75 * vmem_cap)))

    # Resident operands: constant index_map -> fetched once; single buffer.
    resident = lambda shape: pl.BlockSpec(shape, lambda i: (0, 0),
                                          pipeline_mode=pl.Buffered(1))
    # NOTE: if profiling shows exposed DMA (wall >> compute) at large bb, bump
    # the streamed x spec / out spec to pipeline_mode=pl.Buffered(3) — the VMEM
    # freed by single-buffering the weights pays for the extra buffer.

    kernel = functools.partial(resblock_kernel, hid_p=hid_p, out_dim=output_dim,
                               eps=eps, mxu_dtype=mxu_dtype)

    out_padded = pl.pallas_call(
        kernel,
        out_shape=jax.ShapeDtypeStruct((Bp, out_p), out_dtype),
        grid_spec=pltpu.PrefetchScalarGridSpec(
            num_scalar_prefetch=0,
            grid=grid,
            in_specs=[
                pl.BlockSpec((bb, in_p), lambda i: (i, 0)),   # x tile (streamed)
                resident((in_p, wide_p)),                     # [W1 | W3]
                resident((1, hid_p)),                         # b1
                resident((hid_p, out_p)),                     # W2
                resident((1, out_p)),                         # b2 + b3
                resident((1, out_p)),                         # gamma
                resident((1, out_p)),                         # beta
            ],
            out_specs=pl.BlockSpec((bb, out_p), lambda i: (i, 0)),
        ),
        compiler_params=pltpu.CompilerParams(
            dimension_semantics=("parallel",),
            vmem_limit_bytes=vmem_limit,
        ),
    )(xp, w13p, b1r, w2p, b23r, gr, br)

    return out_padded[:B, :output_dim]


def reference_forward(x, w1, b1, w2, b2, w3, b3, gamma, beta):
    """Pure-JAX reference mirroring the PyTorch module (eval mode)."""
    h = jnp.maximum(x @ w1 + b1, 0.0)
    y = h @ w2 + b2
    z = y + (x @ w3 + b3)
    mean = jnp.mean(z, axis=-1, keepdims=True)
    var = jnp.mean((z - mean) ** 2, axis=-1, keepdims=True)
    zn = (z - mean) / jnp.sqrt(var + 1e-5)
    return zn * gamma + beta


def _make_params(key, input_dim, hidden_dim, output_dim):
    k1, k2, k3, kb1, kb2, kb3 = jax.random.split(key, 6)
    w1 = jax.random.normal(k1, (input_dim, hidden_dim), jnp.float32) / jnp.sqrt(input_dim)
    w2 = jax.random.normal(k2, (hidden_dim, output_dim), jnp.float32) / jnp.sqrt(hidden_dim)
    w3 = jax.random.normal(k3, (input_dim, output_dim), jnp.float32) / jnp.sqrt(input_dim)
    b1 = 0.01 * jax.random.normal(kb1, (hidden_dim,), jnp.float32)
    b2 = 0.01 * jax.random.normal(kb2, (output_dim,), jnp.float32)
    b3 = 0.01 * jax.random.normal(kb3, (output_dim,), jnp.float32)
    gamma = jnp.ones((output_dim,), jnp.float32)   # LayerNorm weight
    beta = jnp.zeros((output_dim,), jnp.float32)   # LayerNorm bias
    return w1, b1, w2, b2, w3, b3, gamma, beta


if __name__ == "__main__":
    key = jax.random.PRNGKey(0)

    # Case 1: tiny shapes matching the module example (exercises lane + batch
    # padding and the masked LayerNorm).  f32 MXU operands -> tight tolerance.
    B, input_dim, hidden_dim, output_dim = 8, 16, 32, 16
    kx, kp = jax.random.split(key)
    x = jax.random.normal(kx, (B, input_dim), dtype=jnp.float32)
    params = _make_params(kp, input_dim, hidden_dim, output_dim)

    out = resblock_forward(x, *params, block_b=256, mxu_dtype=jnp.float32)
    out = jax.block_until_ready(out)
    ref = reference_forward(x, *params)
    assert out.shape == (B, output_dim)
    assert jnp.allclose(out, ref, atol=1e-3, rtol=1e-3), "f32 mismatch vs reference"

    # Case 2: lane-dense shapes (no padding, x passed straight through), two
    # grid steps, bf16 MXU operands with f32 accumulate / f32 LayerNorm.
    B2, in2, hid2, out2 = 256, 128, 256, 128
    kx2, kp2 = jax.random.split(kp)
    x2 = jax.random.normal(kx2, (B2, in2), dtype=jnp.float32)
    params2 = _make_params(kp2, in2, hid2, out2)

    out_bf16 = resblock_forward(x2, *params2, block_b=128, mxu_dtype=jnp.bfloat16)
    out_bf16 = jax.block_until_ready(out_bf16)
    ref2 = reference_forward(x2, *params2)
    assert out_bf16.shape == (B2, out2)
    assert jnp.allclose(out_bf16, ref2, atol=0.1, rtol=0.1), "bf16 mismatch vs reference"

    print("KERNEL_OK")
</pallas_src>

<mosaic_0001>
module attributes {stable_mosaic.version = 11 : i64} {
  func.func @resblock_kernel(%arg0: i32, %arg1: memref<16x128xf32, #tpu.memory_space<vmem>>, %arg2: memref<128x256xf32, #tpu.memory_space<vmem>>, %arg3: memref<1x128xf32, #tpu.memory_space<vmem>>, %arg4: memref<128x128xf32, #tpu.memory_space<vmem>>, %arg5: memref<1x128xf32, #tpu.memory_space<vmem>>, %arg6: memref<1x128xf32, #tpu.memory_space<vmem>>, %arg7: memref<1x128xf32, #tpu.memory_space<vmem>>, %arg8: memref<16x128xf32, #tpu.memory_space<vmem>>) attributes {dimension_semantics = [#tpu.dimension_semantics<parallel>], iteration_bounds = array<i64: 1>, scalar_prefetch = 0 : i64, scratch_operands = 0 : i64, tpu.core_type = #tpu.core_type<tc>, window_params = [{transform_indices = @transform_0, window_bounds = array<i64: 16, 128>}, {pipeline_mode = #tpu.pipeline_mode<synchronous>, transform_indices = @transform_1, window_bounds = array<i64: 128, 256>}, {pipeline_mode = #tpu.pipeline_mode<synchronous>, transform_indices = @transform_2, window_bounds = array<i64: 1, 128>}, {pipeline_mode = #tpu.pipeline_mode<synchronous>, transform_indices = @transform_3, window_bounds = array<i64: 128, 128>}, {pipeline_mode = #tpu.pipeline_mode<synchronous>, transform_indices = @transform_4, window_bounds = array<i64: 1, 128>}, {pipeline_mode = #tpu.pipeline_mode<synchronous>, transform_indices = @transform_5, window_bounds = array<i64: 1, 128>}, {pipeline_mode = #tpu.pipeline_mode<synchronous>, transform_indices = @transform_6, window_bounds = array<i64: 1, 128>}, {transform_indices = @transform_7, window_bounds = array<i64: 16, 128>}]} {
    %c0 = arith.constant 0 : index
    %c0_0 = arith.constant 0 : index
    %0 = vector.load %arg1[%c0, %c0_0] : memref<16x128xf32, #tpu.memory_space<vmem>>, vector<16x128xf32>
    %c0_1 = arith.constant 0 : index
    %c0_2 = arith.constant 0 : index
    %1 = vector.load %arg2[%c0_1, %c0_2] : memref<128x256xf32, #tpu.memory_space<vmem>>, vector<128x256xf32>
    %cst = arith.constant dense<0.000000e+00> : vector<16x256xf32>
    %2 = tpu.matmul %0, %1, %cst {dimension_numbers = #tpu.dot_dimension_numbers<[1], [0], [0], [1], [0, 0, 1, 1], [], []>} : vector<16x128xf32>, vector<128x256xf32>, vector<16x256xf32> -> vector<16x256xf32>
    %3 = vector.extract_strided_slice %2 {offsets = [0, 0], sizes = [16, 128], strides = [1, 1]} : vector<16x256xf32> to vector<16x128xf32>
    %c0_3 = arith.constant 0 : index
    %c0_4 = arith.constant 0 : index
    %4 = vector.load %arg3[%c0_3, %c0_4] : memref<1x128xf32, #tpu.memory_space<vmem>>, vector<1x128xf32>
    %5 = vector.broadcast %4 : vector<1x128xf32> to vector<16x128xf32>
    %6 = arith.addf %3, %5 : vector<16x128xf32>
    %cst_5 = arith.constant 0.000000e+00 : f32
    %7 = vector.broadcast %cst_5 : f32 to vector<16x128xf32>
    %8 = arith.maximumf %6, %7 : vector<16x128xf32>
    %9 = vector.extract_strided_slice %2 {offsets = [0, 128], sizes = [16, 128], strides = [1, 1]} : vector<16x256xf32> to vector<16x128xf32>
    %c0_6 = arith.constant 0 : index
    %c0_7 = arith.constant 0 : index
    %10 = vector.load %arg4[%c0_6, %c0_7] : memref<128x128xf32, #tpu.memory_space<vmem>>, vector<128x128xf32>
    %cst_8 = arith.constant dense<0.000000e+00> : vector<16x128xf32>
    %11 = tpu.matmul %8, %10, %cst_8 {dimension_numbers = #tpu.dot_dimension_numbers<[1], [0], [0], [1], [0, 0, 1, 1], [], []>} : vector<16x128xf32>, vector<128x128xf32>, vector<16x128xf32> -> vector<16x128xf32>
    %12 = arith.addf %11, %9 : vector<16x128xf32>
    %c0_9 = arith.constant 0 : index
    %c0_10 = arith.constant 0 : index
    %13 = vector.load %arg5[%c0_9, %c0_10] : memref<1x128xf32, #tpu.memory_space<vmem>>, vector<1x128xf32>
    %14 = vector.broadcast %13 : vector<1x128xf32> to vector<16x128xf32>
    %15 = arith.addf %12, %14 : vector<16x128xf32>
    %16 = tpu.iota {dimensions = array<i32: 1>} : vector<1x128xi32>
    %c16_i32 = arith.constant 16 : i32
    %17 = vector.broadcast %c16_i32 : i32 to vector<1x128xi32>
    %18 = arith.cmpi slt, %16, %17 : vector<1x128xi32>
    %cst_11 = arith.constant 0.000000e+00 : f32
    %19 = vector.shape_cast %18 : vector<1x128xi1> to vector<1x128xi1>
    %20 = vector.broadcast %19 : vector<1x128xi1> to vector<16x128xi1>
    %21 = vector.broadcast %cst_11 : f32 to vector<16x128xf32>
    %22 = arith.select %20, %15, %21 : vector<16x128xi1>, vector<16x128xf32>
    %cst_12 = arith.constant dense<0.000000e+00> : vector<16xf32>
    %23 = vector.multi_reduction <add>, %22, %cst_12 [1] : vector<16x128xf32> to vector<16xf32>
    %24 = vector.shape_cast %23 : vector<16xf32> to vector<16x1xf32>
    %cst_13 = arith.constant 6.250000e-02 : f32
    %25 = vector.broadcast %cst_13 : f32 to vector<16x1xf32>
    %26 = arith.mulf %24, %25 : vector<16x1xf32>
    %27 = vector.broadcast %26 : vector<16x1xf32> to vector<16x128xf32>
    %28 = arith.subf %15, %27 : vector<16x128xf32>
    %cst_14 = arith.constant 0.000000e+00 : f32
    %29 = vector.shape_cast %18 : vector<1x128xi1> to vector<1x128xi1>
    %30 = vector.broadcast %29 : vector<1x128xi1> to vector<16x128xi1>
    %31 = vector.broadcast %cst_14 : f32 to vector<16x128xf32>
    %32 = arith.select %30, %28, %31 : vector<16x128xi1>, vector<16x128xf32>
    %33 = arith.mulf %32, %32 : vector<16x128xf32>
    %cst_15 = arith.constant dense<0.000000e+00> : vector<16xf32>
    %34 = vector.multi_reduction <add>, %33, %cst_15 [1] : vector<16x128xf32> to vector<16xf32>
    %35 = vector.shape_cast %34 : vector<16xf32> to vector<16x1xf32>
    %cst_16 = arith.constant 6.250000e-02 : f32
    %36 = vector.broadcast %cst_16 : f32 to vector<16x1xf32>
    %37 = arith.mulf %35, %36 : vector<16x1xf32>
    %cst_17 = arith.constant 9.99999974E-6 : f32
    %38 = vector.broadcast %cst_17 : f32 to vector<16x1xf32>
    %39 = arith.addf %37, %38 : vector<16x1xf32>
    %40 = math.rsqrt %39 : vector<16x1xf32>
    %41 = vector.broadcast %40 : vector<16x1xf32> to vector<16x128xf32>
    %42 = arith.mulf %28, %41 : vector<16x128xf32>
    %c0_18 = arith.constant 0 : index
    %c0_19 = arith.constant 0 : index
    %43 = vector.load %arg6[%c0_18, %c0_19] : memref<1x128xf32, #tpu.memory_space<vmem>>, vector<1x128xf32>
    %44 = vector.broadcast %43 : vector<1x128xf32> to vector<16x128xf32>
    %45 = arith.mulf %42, %44 : vector<16x128xf32>
    %c0_20 = arith.constant 0 : index
    %c0_21 = arith.constant 0 : index
    %46 = vector.load %arg7[%c0_20, %c0_21] : memref<1x128xf32, #tpu.memory_space<vmem>>, vector<1x128xf32>
    %47 = vector.broadcast %46 : vector<1x128xf32> to vector<16x128xf32>
    %48 = arith.addf %45, %47 : vector<16x128xf32>
    %c0_22 = arith.constant 0 : index
    %c0_23 = arith.constant 0 : index
    %49 = vector.load %arg8[%c0_22, %c0_23] : memref<16x128xf32, #tpu.memory_space<vmem>>, vector<16x128xf32>
    tpu.vector_store %arg8[%c0_22, %c0_23], %48 {strides = array<i32>} : memref<16x128xf32, #tpu.memory_space<vmem>>, vector<16x128xf32>,
    return
  }
  func.func @transform_0(%arg0: i32) -> (i32, i32) {
    %c0_i32 = arith.constant 0 : i32
    %c0_i32_0 = arith.constant 0 : i32
    return %arg0, %c0_i32 : i32, i32
  }
  func.func @transform_1(%arg0: i32) -> (i32, i32) {
    %c0_i32 = arith.constant 0 : i32
    %c0_i32_0 = arith.constant 0 : i32
    %c0_i32_1 = arith.constant 0 : i32
    return %c0_i32, %c0_i32_0 : i32, i32
  }
  func.func @transform_2(%arg0: i32) -> (i32, i32) {
    %c0_i32 = arith.constant 0 : i32
    %c0_i32_0 = arith.constant 0 : i32
    %c0_i32_1 = arith.constant 0 : i32
    return %c0_i32, %c0_i32_0 : i32, i32
  }
  func.func @transform_3(%arg0: i32) -> (i32, i32) {
    %c0_i32 = arith.constant 0 : i32
    %c0_i32_0 = arith.constant 0 : i32
    %c0_i32_1 = arith.constant 0 : i32
    return %c0_i32, %c0_i32_0 : i32, i32
  }
  func.func @transform_4(%arg0: i32) -> (i32, i32) {
    %c0_i32 = arith.constant 0 : i32
    %c0_i32_0 = arith.constant 0 : i32
    %c0_i32_1 = arith.constant 0 : i32
    return %c0_i32, %c0_i32_0 : i32, i32
  }
  func.func @transform_5(%arg0: i32) -> (i32, i32) {
    %c0_i32 = arith.constant 0 : i32
    %c0_i32_0 = arith.constant 0 : i32
    %c0_i32_1 = arith.constant 0 : i32
    return %c0_i32, %c0_i32_0 : i32, i32
  }
  func.func @transform_6(%arg0: i32) -> (i32, i32) {
    %c0_i32 = arith.constant 0 : i32
    %c0_i32_0 = arith.constant 0 : i32
    %c0_i32_1 = arith.constant 0 : i32
    return %c0_i32, %c0_i32_0 : i32, i32
  }
  func.func @transform_7(%arg0: i32) -> (i32, i32) {
    %c0_i32 = arith.constant 0 : i32
    %c0_i32_0 = arith.constant 0 : i32
    return %arg0, %c0_i32 : i32, i32
  }
}

</mosaic_0001>

<bundles_post_ra>
// kernel: resblock_forward.1
= control target key start
LH: loop header
LB: loop body
LE: loop exit
PB: predicated region body
PF: predicated region fallthrough
CT: control target
= control target key end

     0   :  { %v365_v3 = vmov 0.0   ;;  %v248_v59 = vlaneseq  ;;  %s576_s1 = inlined_call_operand.vmem [shape: f32[128,256], index: 1, kind: input, shape index: {}]   ;;  %s577_s3 = inlined_call_operand.vmem [shape: f32[128,128], index: 3, kind: input, shape index: {}]   ;;  %s578_s0 = inlined_call_operand.vmem [shape: f32[16,128], index: 0, kind: input, shape index: {}]   ;;  %s579_s2 = inlined_call_operand.vmem [shape: f32[1,128], index: 2, kind: input, shape index: {}]   ;;  %s580_s4 = inlined_call_operand.vmem [shape: f32[1,128], index: 4, kind: input, shape index: {}]   ;;  %s581_s5 = inlined_call_operand.vmem [shape: f32[1,128], index: 5, kind: input, shape index: {}]   ;;  %s582_s6 = inlined_call_operand.vmem [shape: f32[1,128], index: 6, kind: input, shape index: {}]   ;;  %s583_s7 = inlined_call_operand.vmem [shape: f32[16,128], index: 7, kind: output, shape index: {}]  }
   0x1   :  { %v59_v0 = vld [vmem:[%s576_s1 + $0xf8] sm:$0xff]  ;;  %v58_v1 = vld [vmem:[%s576_s1 + $0xf0] sm:$0xff]  ;;  %v57_v2 = vld [vmem:[%s576_s1 + $0xe8] sm:$0xff]  ;;  %124 = vmatprep.mubr.f32.mxu0 %v365_v3 }
   0x2   :  { %60 = vmatprep.subr.mxu0 %v59_v0  ;;  %v56_v4 = vld [vmem:[%s576_s1 + $0xe0] sm:$0xff]  ;;  %v55_v5 = vld [vmem:[%s576_s1 + $0xd8] sm:$0xff]  ;;  %v54_v6 = vld [vmem:[%s576_s1 + $0xd0] sm:$0xff]  ;;  %v249_v63 = vand.u32 127, %v248_v59 }
   0x3   :  { %61 = vmatpush1.msra.mxu0 %v58_v1  ;;  %v53_v7 = vld [vmem:[%s576_s1 + $0xc8] sm:$0xff]  ;;  %v52_v8 = vld [vmem:[%s576_s1 + $0xc0] sm:$0xff]  ;;  %v51_v9 = vld [vmem:[%s576_s1 + $0xb8] sm:$0xff] }
   0x4   :  { %62 = vmatprep.subr.mxu0 %v57_v2  ;;  %v50_v10 = vld [vmem:[%s576_s1 + $0xb0] sm:$0xff]  ;;  %v49_v11 = vld [vmem:[%s576_s1 + $0xa8] sm:$0xff]  ;;  %v48_v12 = vld [vmem:[%s576_s1 + $0xa0] sm:$0xff]  ;;  %vm250_vm0 = vcmp.lt.s32.totalorder %v249_v63, 16 }
   0x5   :  { %63 = vmatpush1.msra.mxu0 %v56_v4  ;;  %v47_v13 = vld [vmem:[%s576_s1 + $0x98] sm:$0xff]  ;;  %v46_v14 = vld [vmem:[%s576_s1 + $0x90] sm:$0xff]  ;;  %v45_v17 = vld [vmem:[%s576_s1 + $0x88] sm:$0xff] }
   0x6   :  { %64 = vmatprep.subr.mxu0 %v55_v5  ;;  %v163_v15 = vld [vmem:[%s577_s3 + $0x78] sm:$0xff]  ;;  %v162_v16 = vld [vmem:[%s577_s3 + $0x70] sm:$0xff]  ;;  %v44_v18 = vld [vmem:[%s576_s1 + $0x80] sm:$0xff] }
   0x7   :  { %65 = vmatpush1.msra.mxu0 %v54_v6  ;;  %325 = vmatprep.subr.mxu1 %v163_v15  ;;  %v161_v19 = vld [vmem:[%s577_s3 + $0x68] sm:$0xff]  ;;  %v43_v20 = vld [vmem:[%s576_s1 + $0x78] sm:$0xff]  ;;  %v42_v21 = vld [vmem:[%s576_s1 + $0x70] sm:$0xff] }
   0x8   :  { %66 = vmatprep.subr.mxu0 %v53_v7  ;;  %326 = vmatpush3.msra.mxu1 %v163_v15  ;;  %v160_v22 = vld [vmem:[%s577_s3 + $0x60] sm:$0xff]  ;;  %v41_v23 = vld [vmem:[%s576_s1 + $0x68] sm:$0xff]  ;;  %v159_v25 = vld [vmem:[%s577_s3 + $0x58] sm:$0xff] }
   0x9   :  { %67 = vmatpush1.msra.mxu0 %v52_v8  ;;  %327 = vmatprep.subr.mxu1 %v162_v16  ;;  %v40_v24 = vld [vmem:[%s576_s1 + $0x60] sm:$0xff]  ;;  %v39_v26 = vld [vmem:[%s576_s1 + $0x58] sm:$0xff]  ;;  %v38_v27 = vld [vmem:[%s576_s1 + $0x50] sm:$0xff] }
   0xa   :  { %68 = vmatprep.subr.mxu0 %v51_v9  ;;  %328 = vmatpush3.msra.mxu1 %v162_v16  ;;  %v158_v28 = vld [vmem:[%s577_s3 + $0x50] sm:$0xff]  ;;  %v37_v29 = vld [vmem:[%s576_s1 + $0x48] sm:$0xff]  ;;  %v36_v30 = vld [vmem:[%s576_s1 + $0x40] sm:$0xff] }
   0xb   :  { %69 = vmatpush1.msra.mxu0 %v50_v10  ;;  %329 = vmatprep.subr.mxu1 %v161_v19  ;;  %v157_v31 = vld [vmem:[%s577_s3 + $0x48] sm:$0xff]  ;;  %v35_v32 = vld [vmem:[%s576_s1 + $0x38] sm:$0xff]  ;;  %v34_v33 = vld [vmem:[%s576_s1 + $0x30] sm:$0xff] }
   0xc   :  { %70 = vmatprep.subr.mxu0 %v49_v11  ;;  %330 = vmatpush3.msra.mxu1 %v161_v19  ;;  %v156_v34 = vld [vmem:[%s577_s3 + $0x40] sm:$0xff]  ;;  %v33_v35 = vld [vmem:[%s576_s1 + $0x28] sm:$0xff]  ;;  %v155_v37 = vld [vmem:[%s577_s3 + $0x38] sm:$0xff] }
   0xd   :  { %71 = vmatpush1.msra.mxu0 %v48_v12  ;;  %331 = vmatprep.subr.mxu1 %v160_v22  ;;  %v32_v36 = vld [vmem:[%s576_s1 + $0x20] sm:$0xff]  ;;  %v31_v38 = vld [vmem:[%s576_s1 + $0x18] sm:$0xff]  ;;  %v30_v39 = vld [vmem:[%s576_s1 + $0x10] sm:$0xff] }
   0xe   :  { %72 = vmatprep.subr.mxu0 %v47_v13  ;;  %332 = vmatpush3.msra.mxu1 %v160_v22  ;;  %v154_v40 = vld [vmem:[%s577_s3 + $0x30] sm:$0xff]  ;;  %v29_v41 = vld [vmem:[%s576_s1 + $0x8] sm:$0xff]  ;;  %v28_v42 = vld [vmem:[%s576_s1] sm:$0xff] }
   0xf   :  { %73 = vmatpush1.msra.mxu0 %v46_v14  ;;  %333 = vmatprep.subr.mxu1 %v159_v25  ;;  %v153_v43 = vld [vmem:[%s577_s3 + $0x28] sm:$0xff]  ;;  %v26_v44 = vld [vmem:[%s578_s0] sm:$0xff]  ;;  %v151_v47 = vld [vmem:[%s577_s3 + $0x18] sm:$0xff] }
  0x10   :  { %74 = vmatprep.subr.mxu0 %v45_v17  ;;  %334 = vmatpush3.msra.mxu1 %v159_v25  ;;  %v152_v45 = vld [vmem:[%s577_s3 + $0x20] sm:$0xff]  ;;  %v27_v46 = vld [vmem:[%s578_s0 + $0x8] sm:$0xff]  ;;  %v150_v48 = vld [vmem:[%s577_s3 + $0x10] sm:$0xff] }
  0x11   :  { %75 = vmatpush1.msra.mxu0 %v44_v18  ;;  %335 = vmatprep.subr.mxu1 %v158_v28  ;;  %v149_v49 = vld [vmem:[%s577_s3 + $0x8] sm:$0xff]  ;;  %v148_v50 = vld [vmem:[%s577_s3] sm:$0xff] }
  0x12   :  { %76 = vmatprep.subr.mxu0 %v43_v20  ;;  %336 = vmatpush3.msra.mxu1 %v158_v28  ;;  %v303_v51 = vld [vmem:[%s579_s2] ss:$0 sm:$0xff] }
  0x13   :  { %77 = vmatpush1.msra.mxu0 %v42_v21  ;;  %337 = vmatprep.subr.mxu1 %v157_v31  ;;  %v304_v2 = vld [vmem:[%s580_s4] ss:$0 sm:$0xff] }
  0x14   :  { %78 = vmatprep.subr.mxu0 %v41_v23  ;;  %338 = vmatpush3.msra.mxu1 %v157_v31 }
  0x15   :  { %79 = vmatpush1.msra.mxu0 %v40_v24  ;;  %339 = vmatprep.subr.mxu1 %v156_v34  ;;  %v305_v24 = vld [vmem:[%s581_s5] ss:$0 sm:$0xff] }
  0x16   :  { %80 = vmatprep.subr.mxu0 %v39_v26  ;;  %340 = vmatpush3.msra.mxu1 %v156_v34  ;;  %v306_v26 = vld [vmem:[%s582_s6] ss:$0 sm:$0xff] }
  0x17   :  { %81 = vmatpush1.msra.mxu0 %v38_v27  ;;  %341 = vmatprep.subr.mxu1 %v155_v37 }
  0x18   :  { %82 = vmatprep.subr.mxu0 %v37_v29  ;;  %342 = vmatpush3.msra.mxu1 %v155_v37 }
  0x19   :  { %83 = vmatpush1.msra.mxu0 %v36_v30  ;;  %343 = vmatprep.subr.mxu1 %v154_v40 }
  0x1a   :  { %84 = vmatprep.subr.mxu0 %v35_v32  ;;  %344 = vmatpush3.msra.mxu1 %v154_v40 }
  0x1b   :  { %85 = vmatpush1.msra.mxu0 %v34_v33  ;;  %345 = vmatprep.subr.mxu1 %v153_v43 }
  0x1c   :  { %86 = vmatprep.subr.mxu0 %v33_v35  ;;  %346 = vmatpush3.msra.mxu1 %v153_v43 }
  0x1d   :  { %87 = vmatpush1.msra.mxu0 %v32_v36  ;;  %347 = vmatprep.subr.mxu1 %v152_v45 }
  0x1e   :  { %88 = vmatprep.subr.mxu0 %v31_v38  ;;  %348 = vmatpush3.msra.mxu1 %v152_v45 }
  0x1f   :  { %89 = vmatpush1.msra.mxu0 %v30_v39  ;;  %349 = vmatprep.subr.mxu1 %v151_v47 }
  0x20   :  { %90 = vmatprep.subr.mxu0 %v29_v41  ;;  %350 = vmatpush3.msra.mxu1 %v151_v47 }
  0x21   :  { %91 = vmatpush1.msra.mxu0 %v28_v42  ;;  %351 = vmatprep.subr.mxu1 %v150_v48 }
  0x22   :  { %125 = vmatmul.mubr.f32.vlgmr.msra.gmra.mxu0 %v26_v44  ;;  %352 = vmatpush3.msra.mxu1 %v150_v48 }
  0x23   :  { %130 = vmatprep.mubr.f32.mxu0 %v365_v3  ;;  %353 = vmatprep.subr.mxu1 %v149_v49 }
  0x24   :  { %354 = vmatpush3.msra.mxu1 %v149_v49 }
  0x25   :  { %355 = vmatprep.subr.mxu1 %v148_v50 }
  0x26   :  { %131 = vmatmul.mubr.f32.gmra.mxu0 %v27_v46  ;;  %356 = vmatpush3.msra.mxu1 %v148_v50 }
  0xe2   :  { %v126_v52 = vpop.f32.mrf.mxu0 }
  0xe3   :  { %v144_v53 = vadd.f32 %v303_v51, %v126_v52 }
  0xe4   :  { %v128_v54 = vpop.f32.mrf.mxu0 }
  0xe5   :  { %v146_v55 = vmax.f32 %v144_v53, 0.0 }
  0xe6   :  { %v132_v56 = vpop.f32.mrf.mxu0 }
  0xe7   :  { %v145_v57 = vadd.f32 %v303_v51, %v132_v56  ;;  %357 = vmatprep.mubr.f32.mxu1 %v146_v55 }
  0xe8   :  { %v134_v61 = vpop.f32.mrf.mxu0 }
  0xe9   :  { %v147_v58 = vmax.f32 %v145_v57, 0.0 }
  0xeb   :  { %358 = vmatmul.mubr.f32.vlgmr.msra.gmra.mxu1 %v147_v58 }
 0x1ab   :  { %v359_v60 = vpop.f32.mrf.mxu1 }
 0x1ac   :  { %v236_v0 = vadd.f32 %v359_v60, %v134_v61 }
 0x1ad   :  { %v230_v62 = vpop.f32.mrf.mxu1 }
 0x1ae   :  { %v231_v1 = vadd.f32 %v230_v62, %v128_v54  ;;  %v247_v5 = vadd.f32 %v304_v2, %v236_v0 }
 0x1b0   :  { %v246_v3 = vadd.f32 %v304_v2, %v231_v1  ;;  %v254_v6 = vsel %vm250_vm0, %v247_v5, 0.0 }
 0x1b2   :  { %v253_v4 = vsel %vm250_vm0, %v246_v3, 0.0 }
 0x1b3   :  { %255 = vadd.xlane.f32.xlu0 %v253_v4 }
 0x1b7   :  { %257 = vadd.xlane.f32.xlu0 %v254_v6 }
 0x23c   :  { %v256_v7 = vpop.xlane.xlu0 %255 }
 0x23d   :  { %v259_v8 = vmul.f32 0.0625, %v256_v7 }
 0x23f   :  { %v261_v9 = vsub.f32 %v246_v3, %v259_v8 }
 0x240   :  { %v258_v10 = vpop.xlane.xlu0 %257 }
 0x241   :  { %v260_v11 = vmul.f32 0.0625, %v258_v10  ;;  %v263_v12 = vsel %vm250_vm0, %v261_v9, 0.0 }
 0x242   :  { %v265_v13 = vmul.f32 %v263_v12, %v263_v12 }
 0x243   :  { %v262_v14 = vsub.f32 %v247_v5, %v260_v11 }
 0x244   :  { %267 = vadd.xlane.f32.xlu1 %v265_v13 }
 0x245   :  { %v264_v15 = vsel %vm250_vm0, %v262_v14, 0.0 }
 0x246   :  { %v266_v16 = vmul.f32 %v264_v15, %v264_v15 }
 0x248   :  { %269 = vadd.xlane.f32.xlu1 %v266_v16 }
 0x2cd   :  { %v268_v17 = vpop.xlane.xlu1 %267 }
 0x2ce   :  { %v271_v18 = vmul.f32 0.0625, %v268_v17 }
 0x2d0   :  { %v273_v19 = vadd.f32 1e-05, %v271_v18 }
 0x2d1   :  { %v270_v20 = vpop.xlane.xlu1 %269 }
 0x2d2   :  { %361 = vrsqrt.f32 %v273_v19  ;;  %v272_v21 = vmul.f32 0.0625, %v270_v20 }
 0x2d4   :  { %v274_v22 = vadd.f32 1e-05, %v272_v21 }
 0x2d6   :  { %363 = vrsqrt.f32 %v274_v22 }
 0x2df   :  { %v362_v23 = vpop.eup %361 }
 0x2e0   :  { %v277_v25 = vmul.f32 %v362_v23, %v261_v9 }
 0x2e2   :  { %v286_v27 = vmul.f32 %v305_v24, %v277_v25 }
 0x2e3   :  { %v364_v28 = vpop.eup %363 }
 0x2e4   :  { %v295_v29 = vadd.f32 %v306_v26, %v286_v27  ;;  %v278_v30 = vmul.f32 %v364_v28, %v262_v14 }
 0x2e6   :  { %297 = vst [vmem:[%s583_s7] sm:$0xff] %v295_v29  ;;  %v287_v31 = vmul.f32 %v305_v24, %v278_v30 }
 0x2e8   :  { %v296_v32 = vadd.f32 %v306_v26, %v287_v31 }
 0x2ea   :  { %298 = vst [vmem:[%s583_s7 + $0x8] sm:$0xff] %v296_v32 }

</bundles_post_ra>
